<compile_context>
chip_gen: v6e
topology: v6e:2x2x1
jax: 0.10.0
libtpu: 0.0.40
codegen_flags: <defaults>
</compile_context>

<pallas_src>
import jax
import jax.numpy as jnp
from jax.experimental import pallas as pl
from jax.experimental.pallas import tpu as pltpu

LN_EPS = 1e-5


def _round_up(v, m):
    return ((v + m - 1) // m) * m


def _patch_merge_kernel(x_ref, w_ref, b_ref, o_ref):
    """LayerNorm (no affine) over last dim (4C) + bf16 matmul with folded weight."""
    x = x_ref[...].astype(jnp.float32)                       # (TN, 4C)
    mean = jnp.mean(x, axis=-1, keepdims=True)
    xc = x - mean
    var = jnp.mean(xc * xc, axis=-1, keepdims=True)          # biased, like torch LN
    xn = xc * jax.lax.rsqrt(var + LN_EPS)
    acc = jnp.dot(                                           # MXU: bf16 x bf16 -> f32
        xn.astype(jnp.bfloat16), w_ref[...],
        preferred_element_type=jnp.float32,
    )
    o_ref[...] = (acc + b_ref[...].astype(jnp.float32)).astype(o_ref.dtype)


def _norm_reduce(tokens, w_fold_bf16, b_fold):
    """tokens: (N, 4C) -> (N, C2P) via LayerNorm + folded Linear, in Pallas."""
    n, c4 = tokens.shape
    c2p = w_fold_bf16.shape[1]
    itemsize = tokens.dtype.itemsize

    # Per-generation VMEM budget (v7x: 64 MiB physical, v5e/v6e: 128 MiB).
    try:
        info = pltpu.get_tpu_info()
        phys_vmem = getattr(info, "vmem_capacity_bytes", 64 * 1024 * 1024)
    except Exception:
        phys_vmem = 64 * 1024 * 1024
    vmem_limit = min(int(phys_vmem * 3 // 4), 100 * 1024 * 1024)

    # Double-buffered input/output streams must fit in ~half the scoped limit.
    fixed = 2 * (c4 * c2p * 2 + c2p * 4)                     # weight (bf16) + bias (f32)
    stream_budget = max(vmem_limit // 2 - fixed, 1 << 20)
    per_row = 2 * (c4 * itemsize + c2p * itemsize)           # 2 bufs each for in + out
    block_n = min(stream_budget // per_row, 2048, _round_up(n, 16))
    block_n = max(16, (block_n // 16) * 16)

    grid = (pl.cdiv(n, block_n),)

    cost = pl.CostEstimate(
        flops=2 * n * c4 * c2p,
        transcendentals=n,
        bytes_accessed=n * c4 * itemsize + n * c2p * itemsize + c4 * c2p * 2 + c2p * 4,
    )

    return pl.pallas_call(
        _patch_merge_kernel,
        out_shape=jax.ShapeDtypeStruct((n, c2p), tokens.dtype),
        grid_spec=pltpu.PrefetchScalarGridSpec(
            num_scalar_prefetch=0,
            grid=grid,
            in_specs=[
                pl.BlockSpec((block_n, c4), lambda i: (i, 0)),
                pl.BlockSpec((c4, c2p), lambda i: (0, 0)),
                pl.BlockSpec((1, c2p), lambda i: (0, 0)),
            ],
            out_specs=pl.BlockSpec((block_n, c2p), lambda i: (i, 0)),
        ),
        compiler_params=pltpu.CompilerParams(
            dimension_semantics=("parallel",),
            vmem_limit_bytes=vmem_limit,
        ),
        cost_estimate=cost,
    )(tokens, w_fold_bf16, b_fold)


@jax.jit
def patch_merging_2d(x_nchw, gamma, beta, weight):
    """Forward pass of PatchMerging2D.

    x_nchw: (B, C, H, W)   (H, W assumed even, as in the non-warning path)
    gamma, beta: (4C,)     LayerNorm affine params
    weight: (2C, 4C)       nn.Linear(4C, 2C, bias=False).weight (PyTorch layout)
    returns: (B, 2C, H//2, W//2)
    """
    B, C, H, W = x_nchw.shape
    Ho, Wo = H // 2, W // 2
    c4, c2 = 4 * C, 2 * C

    # Single fused gather: NCHW -> (B, Ho, Wo, [x0|x1|x2|x3]*C) as one transpose.
    # 4C index = (2*wp + hp)*C + c, matching torch.cat([x0, x1, x2, x3], -1).
    tokens = (
        x_nchw.reshape(B, C, Ho, 2, Wo, 2)
        .transpose(0, 2, 4, 5, 3, 1)          # (B, Ho, Wo, wp, hp, C)
        .reshape(B * Ho * Wo, c4)
    )

    # Fold LayerNorm affine into the projection (exact up to FP reassociation).
    w_t = jnp.transpose(weight).astype(jnp.float32)          # (4C, 2C)
    w_fold = gamma.astype(jnp.float32)[:, None] * w_t        # (4C, 2C)
    b_fold = beta.astype(jnp.float32) @ w_t                  # (2C,)

    # Lane-dense output: pad output channels to a multiple of 128.
    c2p = _round_up(c2, 128)
    if c2p != c2:
        w_fold = jnp.pad(w_fold, ((0, 0), (0, c2p - c2)))
        b_fold = jnp.pad(b_fold, ((0, c2p - c2),))

    out = _norm_reduce(tokens, w_fold.astype(jnp.bfloat16), b_fold[None, :])

    out = out[:, :c2].reshape(B, Ho, Wo, c2)
    # NOTE: returning channels-last would save one HBM pass, but NCHW is kept
    # to match the PyTorch module's output layout exactly.
    return jnp.transpose(out, (0, 3, 1, 2))                  # NCHW


def _reference(x_nchw, gamma, beta, weight):
    """Pure-JAX f32 reference for correctness checking (mirrors the torch code)."""
    B, C, H, W = x_nchw.shape
    x = jnp.transpose(x_nchw, (0, 2, 3, 1))
    x0 = x[:, 0::2, 0::2, :]
    x1 = x[:, 1::2, 0::2, :]
    x2 = x[:, 0::2, 1::2, :]
    x3 = x[:, 1::2, 1::2, :]
    xc = jnp.concatenate([x0, x1, x2, x3], axis=-1).astype(jnp.float32)
    mean = jnp.mean(xc, axis=-1, keepdims=True)
    var = jnp.mean((xc - mean) ** 2, axis=-1, keepdims=True)
    xn = (xc - mean) / jnp.sqrt(var + LN_EPS) * gamma + beta
    y = jnp.einsum("bhwk,ok->bhwo", xn, weight.astype(jnp.float32))
    return jnp.transpose(y, (0, 3, 1, 2)).astype(x_nchw.dtype)


if __name__ == "__main__":
    B, C, H, W = 2, 4, 16, 16
    key = jax.random.PRNGKey(0)
    kx, kg, kb, kw = jax.random.split(key, 4)

    x = jax.random.normal(kx, (B, C, H, W), dtype=jnp.float32)
    # Deterministic "trained-looking" params (not identity, so LN affine is exercised).
    gamma = 1.0 + 0.1 * jax.random.normal(kg, (4 * C,), dtype=jnp.float32)
    beta = 0.1 * jax.random.normal(kb, (4 * C,), dtype=jnp.float32)
    weight = jax.random.normal(kw, (2 * C, 4 * C), dtype=jnp.float32) * (4 * C) ** -0.5

    out = patch_merging_2d(x, gamma, beta, weight)
    jax.block_until_ready(out)

    ref = _reference(x, gamma, beta, weight)
    assert out.shape == (B, 2 * C, H // 2, W // 2), out.shape
    # Tolerance loosened vs the f32 reference: the kernel does the projection in
    # bf16 (f32 accumulation) with the LN affine folded into the weight.
    assert jnp.allclose(out, ref, atol=3e-2, rtol=3e-2), float(
        jnp.max(jnp.abs(out - ref))
    )
    print("KERNEL_OK")
</pallas_src>

<mosaic_0001>
module attributes {stable_mosaic.version = 11 : i64} {
  func.func @_patch_merge_kernel(%arg0: i32, %arg1: memref<128x16xf32, #tpu.memory_space<vmem>>, %arg2: memref<16x128xbf16, #tpu.memory_space<vmem>>, %arg3: memref<1x128xf32, #tpu.memory_space<vmem>>, %arg4: memref<128x128xf32, #tpu.memory_space<vmem>>) attributes {dimension_semantics = [#tpu.dimension_semantics<parallel>], iteration_bounds = array<i64: 1>, scalar_prefetch = 0 : i64, scratch_operands = 0 : i64, tpu.core_type = #tpu.core_type<tc>, window_params = [{transform_indices = @transform_0, window_bounds = array<i64: 128, 16>}, {pipeline_mode = #tpu.pipeline_mode<synchronous>, transform_indices = @transform_1, window_bounds = array<i64: 16, 128>}, {pipeline_mode = #tpu.pipeline_mode<synchronous>, transform_indices = @transform_2, window_bounds = array<i64: 1, 128>}, {transform_indices = @transform_3, window_bounds = array<i64: 128, 128>}]} {
    %c0 = arith.constant 0 : index
    %c0_0 = arith.constant 0 : index
    %0 = vector.load %arg1[%c0, %c0_0] : memref<128x16xf32, #tpu.memory_space<vmem>>, vector<128x16xf32>
    %cst = arith.constant dense<0.000000e+00> : vector<128xf32>
    %1 = vector.multi_reduction <add>, %0, %cst [1] : vector<128x16xf32> to vector<128xf32>
    %2 = vector.shape_cast %1 : vector<128xf32> to vector<128x1xf32>
    %cst_1 = arith.constant 1.600000e+01 : f32
    %3 = vector.broadcast %cst_1 : f32 to vector<128x1xf32>
    %4 = arith.divf %2, %3 : vector<128x1xf32>
    %5 = vector.broadcast %4 : vector<128x1xf32> to vector<128x16xf32>
    %6 = arith.subf %0, %5 : vector<128x16xf32>
    %7 = arith.mulf %6, %6 : vector<128x16xf32>
    %cst_2 = arith.constant dense<0.000000e+00> : vector<128xf32>
    %8 = vector.multi_reduction <add>, %7, %cst_2 [1] : vector<128x16xf32> to vector<128xf32>
    %9 = vector.shape_cast %8 : vector<128xf32> to vector<128x1xf32>
    %cst_3 = arith.constant 1.600000e+01 : f32
    %10 = vector.broadcast %cst_3 : f32 to vector<128x1xf32>
    %11 = arith.divf %9, %10 : vector<128x1xf32>
    %cst_4 = arith.constant 9.99999974E-6 : f32
    %12 = vector.broadcast %cst_4 : f32 to vector<128x1xf32>
    %13 = arith.addf %11, %12 : vector<128x1xf32>
    %14 = math.rsqrt %13 : vector<128x1xf32>
    %15 = vector.broadcast %14 : vector<128x1xf32> to vector<128x16xf32>
    %16 = arith.mulf %6, %15 : vector<128x16xf32>
    %17 = arith.truncf %16 : vector<128x16xf32> to vector<128x16xbf16>
    %c0_5 = arith.constant 0 : index
    %c0_6 = arith.constant 0 : index
    %18 = vector.load %arg2[%c0_5, %c0_6] : memref<16x128xbf16, #tpu.memory_space<vmem>>, vector<16x128xbf16>
    %cst_7 = arith.constant dense<0.000000e+00> : vector<128x128xf32>
    %19 = tpu.matmul %17, %18, %cst_7 {dimension_numbers = #tpu.dot_dimension_numbers<[1], [0], [0], [1], [0, 0, 1, 1], [], []>} : vector<128x16xbf16>, vector<16x128xbf16>, vector<128x128xf32> -> vector<128x128xf32>
    %c0_8 = arith.constant 0 : index
    %c0_9 = arith.constant 0 : index
    %20 = vector.load %arg3[%c0_8, %c0_9] : memref<1x128xf32, #tpu.memory_space<vmem>>, vector<1x128xf32>
    %21 = vector.broadcast %20 : vector<1x128xf32> to vector<128x128xf32>
    %22 = arith.addf %19, %21 : vector<128x128xf32>
    %c0_10 = arith.constant 0 : index
    %c0_11 = arith.constant 0 : index
    %23 = vector.load %arg4[%c0_10, %c0_11] : memref<128x128xf32, #tpu.memory_space<vmem>>, vector<128x128xf32>
    tpu.vector_store %arg4[%c0_10, %c0_11], %22 {strides = array<i32>} : memref<128x128xf32, #tpu.memory_space<vmem>>, vector<128x128xf32>,
    return
  }
  func.func @transform_0(%arg0: i32) -> (i32, i32) {
    %c0_i32 = arith.constant 0 : i32
    %c0_i32_0 = arith.constant 0 : i32
    return %arg0, %c0_i32 : i32, i32
  }
  func.func @transform_1(%arg0: i32) -> (i32, i32) {
    %c0_i32 = arith.constant 0 : i32
    %c0_i32_0 = arith.constant 0 : i32
    %c0_i32_1 = arith.constant 0 : i32
    return %c0_i32, %c0_i32_0 : i32, i32
  }
  func.func @transform_2(%arg0: i32) -> (i32, i32) {
    %c0_i32 = arith.constant 0 : i32
    %c0_i32_0 = arith.constant 0 : i32
    %c0_i32_1 = arith.constant 0 : i32
    return %c0_i32, %c0_i32_0 : i32, i32
  }
  func.func @transform_3(%arg0: i32) -> (i32, i32) {
    %c0_i32 = arith.constant 0 : i32
    %c0_i32_0 = arith.constant 0 : i32
    return %arg0, %c0_i32 : i32, i32
  }
}

</mosaic_0001>

<bundles_post_ra>
// kernel: patch_merging_2d.1
= control target key start
LH: loop header
LB: loop body
LE: loop exit
PB: predicated region body
PF: predicated region fallthrough
CT: control target
= control target key end

     0   :  { %vm31_vm0 = vcmask 130048   ;;  %s759_s0 = inlined_call_operand.vmem [shape: f32[128,16], index: 0, kind: input, shape index: {}]   ;;  %s760_s1 = inlined_call_operand.vmem [shape: bf16[16,128], index: 1, kind: input, shape index: {}]   ;;  %s761_s2 = inlined_call_operand.vmem [shape: f32[1,128], index: 2, kind: input, shape index: {}]   ;;  %s762_s3 = inlined_call_operand.vmem [shape: f32[128,128], index: 3, kind: output, shape index: {}]  }
   0x1   :  { %v15_v0 = vld [vmem:[%s759_s0] sm:$0xff]  ;;  %v16_v2 = vld [vmem:[%s759_s0 + $0x8] sm:$0xff]  ;;  %v17_v8 = vld [vmem:[%s759_s0 + $0x10] sm:$0xff] }
   0x2   :  { %v23_v1 = vld [vmem:[%s759_s0 + $0x40] sm:$0xff]  ;;  %v32_v3 = vsel %vm31_vm0, %v15_v0, 0.0  ;;  %v24_v5 = vld [vmem:[%s759_s0 + $0x48] sm:$0xff]  ;;  %v35_v6 = vsel %vm31_vm0, %v16_v2, 0.0  ;;  %v18_v9 = vld [vmem:[%s759_s0 + $0x18] sm:$0xff]  ;;  %v38_v10 = vsel %vm31_vm0, %v17_v8, 0.0 }
   0x3   :  { %v56_v4 = vsel %vm31_vm0, %v23_v1, 0.0  ;;  %33 = vadd.xlane.f32.xlu0 %v32_v3  ;;  %v59_v7 = vsel %vm31_vm0, %v24_v5, 0.0  ;;  %v41_v11 = vsel %vm31_vm0, %v18_v9, 0.0  ;;  %v524_v12 = vld [vmem:[%s759_s0 + $0x50] sm:$0xff]  ;;  %v529_v13 = vld [vmem:[%s759_s0 + $0x58] sm:$0xff]  ;;  %v538_v16 = vld [vmem:[%s759_s0 + $0x20] sm:$0xff] }
   0x4   :  { %57 = vadd.xlane.f32.xlu1 %v56_v4  ;;  %v62_v14 = vsel %vm31_vm0, %v524_v12, 0.0  ;;  %v65_v15 = vsel %vm31_vm0, %v529_v13, 0.0  ;;  %v543_v17 = vld [vmem:[%s759_s0 + $0x28] sm:$0xff]  ;;  %v44_v18 = vsel %vm31_vm0, %v538_v16, 0.0  ;;  %v552_v20 = vld [vmem:[%s759_s0 + $0x60] sm:$0xff]  ;;  %v566_v24 = vld [vmem:[%s759_s0 + $0x30] sm:$0xff] }
   0x5   :  { %v47_v19 = vsel %vm31_vm0, %v543_v17, 0.0  ;;  %v557_v21 = vld [vmem:[%s759_s0 + $0x68] sm:$0xff]  ;;  %v68_v22 = vsel %vm31_vm0, %v552_v20, 0.0  ;;  %v571_v25 = vld [vmem:[%s759_s0 + $0x38] sm:$0xff]  ;;  %v50_v26 = vsel %vm31_vm0, %v566_v24, 0.0  ;;  %v580_v28 = vld [vmem:[%s759_s0 + $0x70] sm:$0xff] }
   0x6   :  { %v71_v23 = vsel %vm31_vm0, %v557_v21, 0.0  ;;  %v53_v27 = vsel %vm31_vm0, %v571_v25, 0.0  ;;  %v585_v29 = vld [vmem:[%s759_s0 + $0x78] sm:$0xff]  ;;  %v74_v30 = vsel %vm31_vm0, %v580_v28, 0.0 }
   0x7   :  { %36 = vadd.xlane.f32.xlu0 %v35_v6  ;;  %v77_v31 = vsel %vm31_vm0, %v585_v29, 0.0 }
   0x8   :  { %60 = vadd.xlane.f32.xlu1 %v59_v7 }
   0xb   :  { %39 = vadd.xlane.f32.xlu0 %v38_v10 }
   0xc   :  { %42 = vadd.xlane.f32.xlu1 %v41_v11 }
   0xf   :  { %63 = vadd.xlane.f32.xlu0 %v62_v14 }
  0x10   :  { %66 = vadd.xlane.f32.xlu1 %v65_v15 }
  0x13   :  { %45 = vadd.xlane.f32.xlu0 %v44_v18 }
  0x14   :  { %48 = vadd.xlane.f32.xlu1 %v47_v19 }
  0x17   :  { %69 = vadd.xlane.f32.xlu0 %v68_v22 }
  0x18   :  { %72 = vadd.xlane.f32.xlu1 %v71_v23 }
  0x1b   :  { %51 = vadd.xlane.f32.xlu0 %v50_v26 }
  0x1c   :  { %54 = vadd.xlane.f32.xlu1 %v53_v27 }
  0x1f   :  { %75 = vadd.xlane.f32.xlu0 %v74_v30 }
  0x20   :  { %78 = vadd.xlane.f32.xlu1 %v77_v31 }
  0x8c   :  { %v34_v32 = vpop.xlane.xlu0 %33 }
  0x8d   :  { %v58_v33 = vpop.xlane.xlu1 %57  ;;  %v81_v34 = vmul.f32 0.0625, %v34_v32 }
  0x8e   :  { %v89_v35 = vmul.f32 0.0625, %v58_v33 }
  0x8f   :  { %v591_v36 = vsub.f32 %v15_v0, %v81_v34 }
  0x90   :  { %v593_v37 = vsub.f32 %v23_v1, %v89_v35  ;;  %v37_v38 = vpop.xlane.xlu0 %36 }
  0x91   :  { %v61_v39 = vpop.xlane.xlu1 %60  ;;  %v82_v40 = vmul.f32 0.0625, %v37_v38  ;;  %v113_v42 = vmul.f32 %v591_v36, %v591_v36 }
  0x92   :  { %v90_v41 = vmul.f32 0.0625, %v61_v39  ;;  %v121_v43 = vmul.f32 %v593_v37, %v593_v37 }
  0x93   :  { %v599_v44 = vsub.f32 %v16_v2, %v82_v40  ;;  %v129_v46 = vsel %vm31_vm0, %v113_v42, 0.0 }
  0x94   :  { %v601_v45 = vsub.f32 %v24_v5, %v90_v41  ;;  %130 = vadd.xlane.f32.xlu0 %v129_v46  ;;  %v40_v47 = vpop.xlane.xlu0 %39  ;;  %v153_v49 = vsel %vm31_vm0, %v121_v43, 0.0 }
  0x95   :  { %v43_v48 = vpop.xlane.xlu1 %42  ;;  %v83_v50 = vmul.f32 0.0625, %v40_v47  ;;  %v114_v52 = vmul.f32 %v599_v44, %v599_v44 }
  0x96   :  { %v84_v51 = vmul.f32 0.0625, %v43_v48  ;;  %v122_v53 = vmul.f32 %v601_v45, %v601_v45 }
  0x97   :  { %v609_v54 = vsub.f32 %v17_v8, %v83_v50  ;;  %v132_v56 = vsel %vm31_vm0, %v114_v52, 0.0 }
  0x98   :  { %v611_v55 = vsub.f32 %v18_v9, %v84_v51  ;;  %154 = vadd.xlane.f32.xlu0 %v153_v49  ;;  %133 = vadd.xlane.f32.xlu1 %v132_v56  ;;  %v64_v57 = vpop.xlane.xlu0 %63  ;;  %v156_v59 = vsel %vm31_vm0, %v122_v53, 0.0 }
  0x99   :  { %v67_v58 = vpop.xlane.xlu1 %66  ;;  %v91_v60 = vmul.f32 0.0625, %v64_v57  ;;  %v115_v62 = vmul.f32 %v609_v54, %v609_v54 }
  0x9a   :  { %v92_v61 = vmul.f32 0.0625, %v67_v58  ;;  %v116_v63 = vmul.f32 %v611_v55, %v611_v55 }
  0x9b   :  { %v620_v0 = vsub.f32 %v524_v12, %v91_v60  ;;  %v135_v2 = vsel %vm31_vm0, %v115_v62, 0.0 }
  0x9c   :  { %v623_v1 = vsub.f32 %v529_v13, %v92_v61  ;;  %157 = vadd.xlane.f32.xlu1 %v156_v59  ;;  %136 = vadd.xlane.f32.xlu0 %v135_v2  ;;  %v46_v3 = vpop.xlane.xlu0 %45  ;;  %v138_v5 = vsel %vm31_vm0, %v116_v63, 0.0 }
  0x9d   :  { %v49_v4 = vpop.xlane.xlu1 %48  ;;  %v85_v6 = vmul.f32 0.0625, %v46_v3  ;;  %v123_v8 = vmul.f32 %v620_v0, %v620_v0 }
  0x9e   :  { %v86_v7 = vmul.f32 0.0625, %v49_v4  ;;  %v124_v9 = vmul.f32 %v623_v1, %v623_v1 }
  0x9f   :  { %v632_v10 = vsub.f32 %v538_v16, %v85_v6  ;;  %v159_v12 = vsel %vm31_vm0, %v123_v8, 0.0 }
  0xa0   :  { %v635_v11 = vsub.f32 %v543_v17, %v86_v7  ;;  %139 = vadd.xlane.f32.xlu1 %v138_v5  ;;  %160 = vadd.xlane.f32.xlu0 %v159_v12  ;;  %v70_v13 = vpop.xlane.xlu0 %69  ;;  %v162_v15 = vsel %vm31_vm0, %v124_v9, 0.0 }
  0xa1   :  { %v73_v14 = vpop.xlane.xlu1 %72  ;;  %v93_v18 = vmul.f32 0.0625, %v70_v13  ;;  %v117_v22 = vmul.f32 %v632_v10, %v632_v10 }
  0xa2   :  { %v94_v19 = vmul.f32 0.0625, %v73_v14  ;;  %v118_v16 = vmul.f32 %v635_v11, %v635_v11 }
  0xa3   :  { %v644_v23 = vsub.f32 %v552_v20, %v93_v18  ;;  %v141_v26 = vsel %vm31_vm0, %v117_v22, 0.0 }
  0xa4   :  { %v647_v17 = vsub.f32 %v557_v21, %v94_v19  ;;  %163 = vadd.xlane.f32.xlu1 %v162_v15  ;;  %142 = vadd.xlane.f32.xlu0 %v141_v26  ;;  %v52_v27 = vpop.xlane.xlu0 %51  ;;  %v144_v31 = vsel %vm31_vm0, %v118_v16, 0.0 }
  0xa5   :  { %v55_v30 = vpop.xlane.xlu1 %54  ;;  %v87_v32 = vmul.f32 0.0625, %v52_v27  ;;  %v125_v34 = vmul.f32 %v644_v23, %v644_v23 }
  0xa6   :  { %v88_v33 = vmul.f32 0.0625, %v55_v30  ;;  %v126_v20 = vmul.f32 %v647_v17, %v647_v17 }
  0xa7   :  { %v656_v35 = vsub.f32 %v566_v24, %v87_v32  ;;  %v165_v38 = vsel %vm31_vm0, %v125_v34, 0.0 }
  0xa8   :  { %v659_v21 = vsub.f32 %v571_v25, %v88_v33  ;;  %145 = vadd.xlane.f32.xlu1 %v144_v31  ;;  %166 = vadd.xlane.f32.xlu0 %v165_v38  ;;  %v76_v39 = vpop.xlane.xlu0 %75  ;;  %v168_v41 = vsel %vm31_vm0, %v126_v20, 0.0 }
  0xa9   :  { %v79_v40 = vpop.xlane.xlu1 %78  ;;  %v95_v42 = vmul.f32 0.0625, %v76_v39  ;;  %v119_v46 = vmul.f32 %v656_v35, %v656_v35 }
  0xaa   :  { %v96_v43 = vmul.f32 0.0625, %v79_v40  ;;  %v120_v24 = vmul.f32 %v659_v21, %v659_v21 }
  0xab   :  { %v668_v47 = vsub.f32 %v580_v28, %v95_v42  ;;  %v147_v48 = vsel %vm31_vm0, %v119_v46, 0.0 }
  0xac   :  { %v671_v25 = vsub.f32 %v585_v29, %v96_v43  ;;  %169 = vadd.xlane.f32.xlu1 %v168_v41  ;;  %148 = vadd.xlane.f32.xlu0 %v147_v48  ;;  %v150_v49 = vsel %vm31_vm0, %v120_v24, 0.0  ;;  %v444_v29 = vld [vmem:[%s760_s1] sm:$0xff]  }
  0xad   :  { %v127_v50 = vmul.f32 %v668_v47, %v668_v47  ;;  %424 = vmatprep.subr.bf16.mxu0 %v444_v29  ;;  %442 = vmatprep.subr.bf16.mxu1 %v444_v29 }
  0xae   :  { %v128_v51 = vmul.f32 %v671_v25, %v671_v25  ;;  %425 = vmatpush3.bf16.msra.mxu0 %v444_v29  ;;  %443 = vmatpush3.bf16.msra.mxu1 %v444_v29 }
  0xaf   :  { %v171_v52 = vsel %vm31_vm0, %v127_v50, 0.0 }
  0xb0   :  { %151 = vadd.xlane.f32.xlu1 %v150_v49  ;;  %172 = vadd.xlane.f32.xlu0 %v171_v52  ;;  %v174_v28 = vsel %vm31_vm0, %v128_v51, 0.0 }
  0xb4   :  { %175 = vadd.xlane.f32.xlu1 %v174_v28 }
 0x11d   :  { %v131_v53 = vpop.xlane.xlu0 %130 }
 0x11e   :  { %v177_v56 = vmul.f32 0.0625, %v131_v53 }
 0x120   :  { %v193_v57 = vadd.f32 1e-05, %v177_v56 }
 0x121   :  { %v134_v58 = vpop.xlane.xlu1 %133  ;;  %v155_v59 = vpop.xlane.xlu0 %154 }
 0x122   :  { %v178_v60 = vmul.f32 0.0625, %v134_v58  ;;  %v185_v61 = vmul.f32 0.0625, %v155_v59  ;;  %445 = vrsqrt.f32 %v193_v57 }
 0x124   :  { %v194_v62 = vadd.f32 1e-05, %v178_v60  ;;  %v201_v63 = vadd.f32 1e-05, %v185_v61 }
 0x125   :  { %v158_v2 = vpop.xlane.xlu1 %157  ;;  %v137_v3 = vpop.xlane.xlu0 %136 }
 0x126   :  { %447 = vrsqrt.f32 %v194_v62  ;;  %v186_v4 = vmul.f32 0.0625, %v158_v2  ;;  %v179_v5 = vmul.f32 0.0625, %v137_v3 }
 0x127   :  { %449 = vrsqrt.f32 %v201_v63 }
 0x128   :  { %v202_v6 = vadd.f32 1e-05, %v186_v4  ;;  %v195_v7 = vadd.f32 1e-05, %v179_v5 }
 0x129   :  { %v140_v8 = vpop.xlane.xlu1 %139  ;;  %v161_v9 = vpop.xlane.xlu0 %160 }
 0x12a   :  { %451 = vrsqrt.f32 %v202_v6  ;;  %v180_v12 = vmul.f32 0.0625, %v140_v8  ;;  %v187_v13 = vmul.f32 0.0625, %v161_v9 }
 0x12b   :  { %453 = vrsqrt.f32 %v195_v7 }
 0x12c   :  { %v196_v14 = vadd.f32 1e-05, %v180_v12  ;;  %v203_v15 = vadd.f32 1e-05, %v187_v13 }
 0x12d   :  { %v164_v18 = vpop.xlane.xlu1 %163  ;;  %v143_v19 = vpop.xlane.xlu0 %142 }
 0x12e   :  { %455 = vrsqrt.f32 %v196_v14  ;;  %v188_v22 = vmul.f32 0.0625, %v164_v18  ;;  %v181_v16 = vmul.f32 0.0625, %v143_v19 }
 0x12f   :  { %v446_v26 = vpop.eup %445  ;;  %457 = vrsqrt.f32 %v203_v15 }
 0x130   :  { %v204_v27 = vadd.f32 1e-05, %v188_v22  ;;  %v197_v30 = vadd.f32 1e-05, %v181_v16  ;;  %v225_v38 = vmul.f32 %v446_v26, %v591_v36 }
 0x131   :  { %v146_v31 = vpop.xlane.xlu1 %145  ;;  %v167_v32 = vpop.xlane.xlu0 %166 }
 0x132   :  { %459 = vrsqrt.f32 %v204_v27  ;;  %v182_v33 = vmul.f32 0.0625, %v146_v31  ;;  %v189_v34 = vmul.f32 0.0625, %v167_v32 }
 0x133   :  { %v448_v20 = vpop.eup %447  ;;  %461 = vrsqrt.f32 %v197_v30 }
 0x134   :  { %v450_v39 = vpop.eup %449  ;;  %v198_v40 = vadd.f32 1e-05, %v182_v33  ;;  %v205_v41 = vadd.f32 1e-05, %v189_v34  ;;  %v226_v42 = vmul.f32 %v448_v20, %v599_v44 }
 0x135   :  { %v170_v43 = vpop.xlane.xlu1 %169  ;;  %v149_v46 = vpop.xlane.xlu0 %148  ;;  %v233_v51 = vmul.f32 %v450_v39, %v593_v37 }
 0x136   :  { %463 = vrsqrt.f32 %v198_v40  ;;  %v190_v24 = vmul.f32 0.0625, %v170_v43  ;;  %v183_v48 = vmul.f32 0.0625, %v149_v46  ;;  %v241_v49 = vpack.c.bf16 %v226_v42, %v225_v38 }
 0x137   :  { %v452_v50 = vpop.eup %451  ;;  %465 = vrsqrt.f32 %v205_v41 }
 0x138   :  { %v454_v52 = vpop.eup %453  ;;  %v206_v28 = vadd.f32 1e-05, %v190_v24  ;;  %v199_v29 = vadd.f32 1e-05, %v183_v48  ;;  %426 = vmatprep.mubr.msk.bf16.mxu0 %vm31_vm0, %v241_v49  ;;  %v234_v36 = vmul.f32 %v452_v50, %v601_v45 }
 0x139   :  { %v152_v53 = vpop.xlane.xlu1 %151  ;;  %v173_v56 = vpop.xlane.xlu0 %172  ;;  %v227_v60 = vmul.f32 %v454_v52, %v609_v54 }
 0x13a   :  { %467 = vrsqrt.f32 %v206_v28  ;;  %v184_v44 = vmul.f32 0.0625, %v152_v53  ;;  %v191_v57 = vmul.f32 0.0625, %v173_v56  ;;  %v245_v58 = vpack.c.bf16 %v234_v36, %v233_v51 }
 0x13b   :  { %v456_v59 = vpop.eup %455  ;;  %469 = vrsqrt.f32 %v199_v29 }
 0x13c   :  { %v200_v61 = vadd.f32 1e-05, %v184_v44  ;;  %v207_v37 = vadd.f32 1e-05, %v191_v57  ;;  %434 = vmatprep.mubr.msk.bf16.mxu1 %vm31_vm0, %v245_v58  ;;  %v228_v62 = vmul.f32 %v456_v59, %v611_v55  ;;  %v458_v63 = vpop.eup %457 }
 0x13d   :  { %v176_v2 = vpop.xlane.xlu1 %175  ;;  %v235_v6 = vmul.f32 %v458_v63, %v620_v0 }
 0x13e   :  { %471 = vrsqrt.f32 %v200_v61  ;;  %v192_v45 = vmul.f32 0.0625, %v176_v2  ;;  %v242_v3 = vpack.c.bf16 %v228_v62, %v227_v60 }
 0x13f   :  { %v460_v4 = vpop.eup %459  ;;  %473 = vrsqrt.f32 %v207_v37 }
 0x140   :  { %v208_v5 = vadd.f32 1e-05, %v192_v45  ;;  %427 = vmatmul.mubr.msk.bf16.vlgmr.msra.gmra.mxu0 %vm31_vm0, %v242_v3  ;;  %v236_v54 = vmul.f32 %v460_v4, %v623_v1  ;;  %v462_v7 = vpop.eup %461 }
 0x141   :  { %v229_v55 = vmul.f32 %v462_v7, %v632_v10 }
 0x142   :  { %475 = vrsqrt.f32 %v208_v5  ;;  %v246_v8 = vpack.c.bf16 %v236_v54, %v235_v6 }
 0x143   :  { %v464_v9 = vpop.eup %463 }
 0x144   :  { %435 = vmatmul.mubr.msk.bf16.vlgmr.msra.gmra.mxu1 %vm31_vm0, %v246_v8  ;;  %v230_v12 = vmul.f32 %v464_v9, %v635_v11  ;;  %v466_v13 = vpop.eup %465 }
 0x145   :  { %v237_v18 = vmul.f32 %v466_v13, %v644_v23 }
 0x146   :  { %v243_v14 = vpack.c.bf16 %v230_v12, %v229_v55 }
 0x147   :  { %v468_v15 = vpop.eup %467 }
 0x148   :  { %430 = vmatprep.mubr.msk.bf16.mxu0 %vm31_vm0, %v243_v14  ;;  %v238_v0 = vmul.f32 %v468_v15, %v647_v17  ;;  %v470_v1 = vpop.eup %469  ;;  %v405_v17 = vld [vmem:[%s761_s2] ss:$0 sm:$0xff] }
 0x149   :  { %v231_v16 = vmul.f32 %v470_v1, %v656_v35 }
 0x14a   :  { %v247_v19 = vpack.c.bf16 %v238_v0, %v237_v18 }
 0x14b   :  { %v472_v22 = vpop.eup %471 }
 0x14c   :  { %438 = vmatprep.mubr.msk.bf16.mxu1 %vm31_vm0, %v247_v19  ;;  %v232_v10 = vmul.f32 %v472_v22, %v659_v21  ;;  %v474_v26 = vpop.eup %473 }
 0x14d   :  { %v239_v30 = vmul.f32 %v474_v26, %v668_v47 }
 0x14e   :  { %v244_v11 = vpack.c.bf16 %v232_v10, %v231_v16 }
 0x14f   :  { %v476_v27 = vpop.eup %475 }
 0x150   :  { %431 = vmatmul.mubr.msk.bf16.gmra.mxu0 %vm31_vm0, %v244_v11  ;;  %v240_v23 = vmul.f32 %v476_v27, %v671_v25 }
 0x152   :  { %v248_v31 = vpack.c.bf16 %v240_v23, %v239_v30 }
 0x154   :  { %439 = vmatmul.mubr.msk.bf16.gmra.mxu1 %vm31_vm0, %v248_v31 }
 0x200   :  { %v428_v32 = vpop.f32.mrf.mxu0 }
 0x201   :  { %v331_v35 = vadd.f32 %v428_v32, %v405_v17 }
 0x202   :  { %v322_v33 = vpop.f32.mrf.mxu0 }
 0x203   :  { %387 = vst [vmem:[%s762_s3 + $0x10] sm:$0xff] %v331_v35  ;;  %v323_v21 = vadd.f32 %v405_v17, %v322_v33 }
 0x204   :  { %v429_v34 = vpop.f32.mrf.mxu0  ;;  %v436_v20 = vpop.f32.mrf.mxu1 }
 0x205   :  { %385 = vst [vmem:[%s762_s3] sm:$0xff] %v323_v21  ;;  %v334_v47 = vadd.f32 %v429_v34, %v405_v17  ;;  %v363_v25 = vadd.f32 %v436_v20, %v405_v17 }
 0x206   :  { %v325_v38 = vpop.f32.mrf.mxu0  ;;  %v354_v39 = vpop.f32.mrf.mxu1 }
 0x207   :  { %388 = vst [vmem:[%s762_s3 + $0x18] sm:$0xff] %v334_v47  ;;  %395 = vst [vmem:[%s762_s3 + $0x50] sm:$0xff] %v363_v25  ;;  %v326_v40 = vadd.f32 %v405_v17, %v325_v38  ;;  %v355_v41 = vadd.f32 %v405_v17, %v354_v39 }
 0x208   :  { %v437_v42 = vpop.f32.mrf.mxu1 }
 0x209   :  { %386 = vst [vmem:[%s762_s3 + $0x8] sm:$0xff] %v326_v40  ;;  %393 = vst [vmem:[%s762_s3 + $0x40] sm:$0xff] %v355_v41  ;;  %v366_v43 = vadd.f32 %v437_v42, %v405_v17 }
 0x20a   :  { %v357_v46 = vpop.f32.mrf.mxu1 }
 0x20b   :  { %396 = vst [vmem:[%s762_s3 + $0x58] sm:$0xff] %v366_v43  ;;  %v358_v24 = vadd.f32 %v405_v17, %v357_v46 }
 0x20d   :  { %394 = vst [vmem:[%s762_s3 + $0x48] sm:$0xff] %v358_v24 }
 0x210   :  { %v432_v48 = vpop.f32.mrf.mxu0 }
 0x211   :  { %v347_v49 = vadd.f32 %v432_v48, %v405_v17 }
 0x212   :  { %v338_v50 = vpop.f32.mrf.mxu0 }
 0x213   :  { %391 = vst [vmem:[%s762_s3 + $0x30] sm:$0xff] %v347_v49  ;;  %v339_v51 = vadd.f32 %v405_v17, %v338_v50 }
 0x214   :  { %v433_v52 = vpop.f32.mrf.mxu0  ;;  %v440_v28 = vpop.f32.mrf.mxu1 }
 0x215   :  { %389 = vst [vmem:[%s762_s3 + $0x20] sm:$0xff] %v339_v51  ;;  %v350_v29 = vadd.f32 %v433_v52, %v405_v17  ;;  %v379_v36 = vadd.f32 %v440_v28, %v405_v17 }
 0x216   :  { %v341_v53 = vpop.f32.mrf.mxu0  ;;  %v370_v56 = vpop.f32.mrf.mxu1 }
 0x217   :  { %392 = vst [vmem:[%s762_s3 + $0x38] sm:$0xff] %v350_v29  ;;  %399 = vst [vmem:[%s762_s3 + $0x70] sm:$0xff] %v379_v36  ;;  %v342_v44 = vadd.f32 %v405_v17, %v341_v53  ;;  %v371_v57 = vadd.f32 %v405_v17, %v370_v56 }
 0x218   :  { %v441_v58 = vpop.f32.mrf.mxu1 }
 0x219   :  { %390 = vst [vmem:[%s762_s3 + $0x28] sm:$0xff] %v342_v44  ;;  %397 = vst [vmem:[%s762_s3 + $0x60] sm:$0xff] %v371_v57  ;;  %v382_v59 = vadd.f32 %v441_v58, %v405_v17 }
 0x21a   :  { %v373_v60 = vpop.f32.mrf.mxu1 }
 0x21b   :  { %400 = vst [vmem:[%s762_s3 + $0x78] sm:$0xff] %v382_v59  ;;  %v374_v61 = vadd.f32 %v405_v17, %v373_v60 }
 0x21d   :  { %398 = vst [vmem:[%s762_s3 + $0x68] sm:$0xff] %v374_v61 }

</bundles_post_ra>
